<compile_context>
chip_gen: v6e
topology: v6e:2x2x1
jax: 0.10.0
libtpu: 0.0.40
codegen_flags: <defaults>
</compile_context>

<pallas_src>
import jax
import jax.numpy as jnp
from jax.experimental import pallas as pl
from jax.experimental.pallas import tpu as pltpu

_BLOCK_BYTE_BUDGET = 8 << 20    # ~8 MiB per buffer; 4 live buffers ~= 32 MiB
_VMEM_LIMIT_BYTES = 48 << 20    # explicit headroom (v5e default scoped is 16 MiB)
_MIN_GRID_SPLITS = 4            # give both v7x TensorCores work on medium inputs


def _identity_copy_kernel(x_ref, o_ref):
    # Straight full-tile VMEM copy; lane-dense output tiles -> unmasked vst.
    o_ref[...] = x_ref[...]


def _sublane_pack(itemsize: int) -> int:
    # Packed sublane multiple: f32 -> 8, bf16 -> 16, int8/fp8 -> 32.
    return max(8, 32 // max(1, itemsize))


def _row_tile(rows: int, row_bytes: int, pack: int) -> int:
    """Row tile: a multiple of `pack` (or the full extent), sized by the VMEM
    byte budget, and split >= _MIN_GRID_SPLITS ways when there is enough work
    so the grid can be sharded across TensorCores."""
    budget_rows = max(pack, (_BLOCK_BYTE_BUDGET // max(1, row_bytes)) // pack * pack)
    want_splits = max(1, min(_MIN_GRID_SPLITS, rows // pack))
    split_rows = (-(-rows // want_splits) + pack - 1) // pack * pack
    tile_rows = max(pack, min(budget_rows, split_rows))
    if tile_rows >= rows:
        tile_rows = rows  # full extent is always a legal block shape
    return tile_rows


def _copy_2d(x2: jax.Array, tile_rows: int) -> jax.Array:
    rows, cols = x2.shape
    itemsize = jnp.dtype(x2.dtype).itemsize
    grid = (pl.cdiv(rows, tile_rows),)
    return pl.pallas_call(
        _identity_copy_kernel,
        out_shape=jax.ShapeDtypeStruct((rows, cols), x2.dtype),
        grid_spec=pltpu.PrefetchScalarGridSpec(
            num_scalar_prefetch=0,
            grid=grid,
            in_specs=[pl.BlockSpec((tile_rows, cols), lambda i: (i, 0))],
            out_specs=pl.BlockSpec((tile_rows, cols), lambda i: (i, 0)),
        ),
        compiler_params=pltpu.CompilerParams(
            dimension_semantics=("parallel",),
            vmem_limit_bytes=_VMEM_LIMIT_BYTES,
        ),
        cost_estimate=pl.CostEstimate(
            flops=0,
            transcendentals=0,
            bytes_accessed=2 * rows * cols * itemsize,
        ),
    )(x2)


def _identity_copy(x: jax.Array) -> jax.Array:
    """Materialize a bit-exact copy of x via a Pallas streaming-copy kernel."""
    orig_shape = x.shape
    dtype = jnp.dtype(x.dtype)
    n = x.size
    if n == 0:
        return x

    if dtype.name in ("int4", "uint4", "int2", "uint2") or dtype.name.startswith("float4"):
        # TODO(synk): packed sub-byte dtypes are not handled by the copy kernel;
        # Identity semantics are preserved by returning the input unchanged.
        return x

    itemsize = dtype.itemsize
    pack = _sublane_pack(itemsize)

    # Lane-dense path: free contiguous reshape to (rows, L), L a multiple of
    # 128 that divides n exactly — no pad in, no slice out.
    lanes = 0
    for cand in (512, 256, 128):
        if n % cand == 0:
            lanes = cand
            break
    if lanes:
        rows = n // lanes
        x2 = x.reshape(rows, lanes)
        tile_rows = _row_tile(rows, lanes * itemsize, pack)
        return _copy_2d(x2, tile_rows).reshape(orig_shape)

    # Ragged fallback: collapse leading dims; the block's last dim equals the
    # full trailing extent (legal even when < 128 lanes), still exactly 2*n
    # bytes of HBM traffic and no pad/slice passes.
    if len(orig_shape) >= 2:
        x2 = x.reshape(-1, orig_shape[-1])
    else:
        x2 = x.reshape(1, n)
    rows, cols = x2.shape
    tile_rows = _row_tile(rows, cols * itemsize, pack)
    return _copy_2d(x2, tile_rows).reshape(orig_shape)


def identity(x: jax.Array, materialize_copy: bool = False) -> jax.Array:
    """Identity forward pass.

    Default (materialize_copy=False) mirrors nn.Identity exactly: return x with
    zero HBM traffic — the optimal implementation. Set materialize_copy=True to
    force an explicit Pallas copy into a distinct buffer.
    """
    if not materialize_copy:
        return x
    return _identity_copy(x)


if __name__ == "__main__":
    key = jax.random.PRNGKey(0)
    k0, k1 = jax.random.split(key)
    # NCHW input, small shapes: batch=2, channels=4, spatial=16x16
    x = jax.random.normal(k0, (2, 4, 16, 16), dtype=jnp.float32)

    # Fast path (the true Identity semantics).
    y_fast = identity(x)
    jax.block_until_ready(y_fast)
    assert y_fast.shape == x.shape and y_fast.dtype == x.dtype
    assert bool(jnp.all(y_fast == x)), "Identity fast-path mismatch"

    # Pallas copy path: lane-dense (rows, 512) tiling, no pad / slice.
    y = identity(x, materialize_copy=True)
    jax.block_until_ready(y)
    assert y.shape == x.shape, (y.shape, x.shape)
    assert y.dtype == x.dtype, (y.dtype, x.dtype)
    assert bool(jnp.all(y == x)), "Identity kernel output mismatch (f32)"

    # Packed-dtype path (bf16 -> sublane pack of 16).
    xb = x.astype(jnp.bfloat16)
    yb = identity(xb, materialize_copy=True)
    jax.block_until_ready(yb)
    assert yb.shape == xb.shape and yb.dtype == xb.dtype
    assert bool(jnp.all(yb == xb)), "Identity kernel output mismatch (bf16)"

    # Ragged path (size not a multiple of 128): full-extent trailing block.
    xr = jax.random.normal(k1, (3, 5, 7), dtype=jnp.float32)
    yr = identity(xr, materialize_copy=True)
    jax.block_until_ready(yr)
    assert yr.shape == xr.shape and yr.dtype == xr.dtype
    assert bool(jnp.all(yr == xr)), "Identity kernel output mismatch (ragged)"

    print("KERNEL_OK")
</pallas_src>

<mosaic_0001>
module attributes {stable_mosaic.version = 11 : i64} {
  func.func @_identity_copy_kernel(%arg0: i32, %arg1: memref<4x512xf32, #tpu.memory_space<vmem>>, %arg2: memref<4x512xf32, #tpu.memory_space<vmem>>) attributes {dimension_semantics = [#tpu.dimension_semantics<parallel>], iteration_bounds = array<i64: 1>, scalar_prefetch = 0 : i64, scratch_operands = 0 : i64, tpu.core_type = #tpu.core_type<tc>, window_params = [{transform_indices = @transform_0, window_bounds = array<i64: 4, 512>}, {transform_indices = @transform_1, window_bounds = array<i64: 4, 512>}]} {
    %c0 = arith.constant 0 : index
    %c0_0 = arith.constant 0 : index
    %0 = vector.load %arg1[%c0, %c0_0] : memref<4x512xf32, #tpu.memory_space<vmem>>, vector<4x512xf32>
    %c0_1 = arith.constant 0 : index
    %c0_2 = arith.constant 0 : index
    %1 = vector.load %arg2[%c0_1, %c0_2] : memref<4x512xf32, #tpu.memory_space<vmem>>, vector<4x512xf32>
    tpu.vector_store %arg2[%c0_1, %c0_2], %0 {strides = array<i32>} : memref<4x512xf32, #tpu.memory_space<vmem>>, vector<4x512xf32>,
    return
  }
  func.func @transform_0(%arg0: i32) -> (i32, i32) {
    %c0_i32 = arith.constant 0 : i32
    %c0_i32_0 = arith.constant 0 : i32
    return %arg0, %c0_i32 : i32, i32
  }
  func.func @transform_1(%arg0: i32) -> (i32, i32) {
    %c0_i32 = arith.constant 0 : i32
    %c0_i32_0 = arith.constant 0 : i32
    return %arg0, %c0_i32 : i32, i32
  }
}

</mosaic_0001>

<bundles_post_ra>
// kernel: tpu_custom_call.1
= control target key start
LH: loop header
LB: loop body
LE: loop exit
PB: predicated region body
PF: predicated region fallthrough
CT: control target
= control target key end

     0   :  { %6 = vsyncpa [#allocation3], 0  ;;  %s104_s0 = inlined_call_operand.hbm [shape: f32[4,512], index: 0, kind: input, shape index: {}]   ;;  %s105_s1 = inlined_call_operand.hbm [shape: f32[4,512], index: 1, kind: output, shape index: {}]  }
   0x1   :  { %7 = vsyncpa [#allocation4], 0  ;;  %s86_s6 = smov [#allocation2]  }
   0x2   :  { %s14_s7 = sshll.u32 %s86_s6, 4  ;;  %s15_s7 = int_to_ptr.vmem [resolvable:$true] %s14_s7 }
   0x3   :  { %s50_s8 = scalar_lea.vmem %s15_s7, 256  ;;  %p55_p1 = scmp.lt.s32.totalorder %s15_s7, %s15_s7 }
   0x4   :  { %p51_p0 = scmp.ne.s32.totalorder %s15_s7, %s50_s8  ;;  %p56_p2 = scmp.lt.s32.totalorder %s50_s8, %s50_s8 }
   0x6   :  { %p57_p3 = por %p56_p2, %p55_p1 }
   0x8   :  { %p58_p4 = pnand %p57_p3, %p51_p0 }
   0xa   :  { %61 = shalt.err (!%p58_p4)
}
   0xb   :  { %17 = dma.hbm_to_vmem [thread:$0]  %s104_s0, 256, %s15_s7, [#allocation3]  }
   0xc   :  { %82 = dma.done.wait [#allocation3], 256  }
   0xd   :  { %83 = vsyncadd [#allocation3], 4294967040  ;;  %s87_s11 = smov [#allocation5]   ;;  %v21_v0 = vld [vmem:[#allocation2] sm:$0xff]  ;;  %v22_v1 = vld [vmem:[#allocation2 + $0x8] sm:$0xff] }
   0xe   :  { %s31_s12 = sshll.u32 %s87_s11, 4  ;;  %23 = vst [vmem:[#allocation5] sm:$0xff] %v21_v0  ;;  %24 = vst [vmem:[#allocation5 + $0x8] sm:$0xff] %v22_v1  ;;  %s32_s12 = int_to_ptr.vmem [resolvable:$true] %s31_s12 }
   0xf   :  { %s62_s13 = scalar_lea.vmem %s32_s12, 256  ;;  %p67_p6 = scmp.lt.s32.totalorder %s32_s12, %s32_s12 }
  0x10   :  { %p63_p5 = scmp.ne.s32.totalorder %s32_s12, %s62_s13  ;;  %p68_p7 = scmp.lt.s32.totalorder %s62_s13, %s62_s13 }
  0x12   :  { %p69_p8 = por %p68_p7, %p67_p6 }
  0x14   :  { %p70_p9 = pnand %p69_p8, %p63_p5 }
  0x16   :  { %73 = shalt.err (!%p70_p9)
}
  0x17   :  { %34 = dma.vmem_to_hbm [thread:$0]  %s32_s12, 256, %s105_s1, [#allocation4]  }
  0x18   :  { %84 = dma.done.wait [#allocation4], 256  }
  0x19   :  { %85 = vsyncadd [#allocation4], 4294967040 }
  0x1a   :  { %38 = vsyncpa [#allocation3], 1 }
  0x1b   :  { %39 = vsyncpa [#allocation4], 1 }

</bundles_post_ra>
